<compile_context>
chip_gen: v6e
topology: v6e:2x2x1
jax: 0.10.0
libtpu: 0.0.40
codegen_flags: <defaults>
</compile_context>

<pallas_src>
import math

import jax
import jax.numpy as jnp
import numpy as np
from jax.experimental import pallas as pl
from jax.experimental.pallas import tpu as pltpu


# ----------------------------- config ---------------------------------------
D_MODEL = 32
NHEAD = 4
DIM_FF = 64
SEQ = 8          # L
BATCH = 2        # N
HEAD_DIM = D_MODEL // NHEAD
LN_EPS = 1e-5


# ----------------------------- kernel ----------------------------------------
def _layernorm(x, w, b):
    # x: (R, E); w, b: (1, E).  Biased variance like nn.LayerNorm.
    mean = jnp.mean(x, axis=-1, keepdims=True)
    xc = x - mean
    var = jnp.mean(xc * xc, axis=-1, keepdims=True)
    return xc * jax.lax.rsqrt(var + LN_EPS) * w + b


def fused_layer_kernel(x_ref, wqkv_ref, wo_ref, w1_ref, w2_ref,
                       bqkv_ref, b1_ref, slab_ref,
                       out_ref, attn_ref):
    """Fused MHA + residual + LN1 + FFN + residual + LN2 (single invocation).

    x_ref:    (L, N*E)  native (L, N, E) buffer viewed 2-D (free reshape);
              lanes [b*E, (b+1)*E) of row l hold src[l, b, :].
    wqkv_ref: (E, 3E)   combined in-proj weight, columns [q | k | v],
                        q columns pre-scaled by 1/sqrt(HEAD_DIM).
    wo_ref:   (E, E)    transposed out-proj weight.
    w1_ref:   (E, F)    transposed linear1 weight.
    w2_ref:   (F, E)    transposed linear2 weight.
    bqkv_ref: (1, 3E)   combined in-proj bias (q part pre-scaled).
    b1_ref:   (1, F)
    slab_ref: (8, E)    rows: [bo, ln1_w, ln1_b, b2, ln2_w, ln2_b, 0, 0].
    out_ref:  (L, N*E)  same native layout as x_ref.
    attn_ref: (N, L, L) head-averaged attention weights.
    """
    E, H, HD, L, N = D_MODEL, NHEAD, HEAD_DIM, SEQ, BATCH

    x2 = x_ref[...]                                             # (L, N*E)
    # De-interleave the two batches into batch-major rows (N*L, E):
    # row n*L + l  <->  src[l, n, :].
    x = jnp.concatenate([x2[:, b * E:(b + 1) * E] for b in range(N)], axis=0)

    slab = slab_ref[...]                                        # (8, E)
    bo   = slab[0:1, :]
    ln1w = slab[1:2, :]
    ln1b = slab[2:3, :]
    b2   = slab[3:4, :]
    ln2w = slab[4:5, :]
    ln2b = slab[5:6, :]

    # --- combined QKV projection: one MXU matmul (scale already folded) ------
    qkv = jnp.dot(x, wqkv_ref[...],
                  preferred_element_type=jnp.float32) + bqkv_ref[...]   # (N*L, 3E)

    # --- regroup to (N*H, L, HD) for batched score/context matmuls -----------
    def head_group(off):
        return jnp.stack(
            [qkv[n * L:(n + 1) * L, off + h * HD: off + (h + 1) * HD]
             for n in range(N) for h in range(H)], axis=0)              # (N*H, L, HD)

    qg = head_group(0)
    kg = head_group(E)
    vg = head_group(2 * E)

    # --- scores + softmax (exact divide: attn weights must sum to 1) ---------
    s = jnp.einsum('bqd,bkd->bqk', qg, kg,
                   preferred_element_type=jnp.float32)                  # (N*H, L, L)
    s = s - jnp.max(s, axis=-1, keepdims=True)
    e = jnp.exp(s)
    p = e / jnp.sum(e, axis=-1, keepdims=True)

    # PyTorch MHA (need_weights=True) returns head-averaged weights per batch.
    for n in range(N):
        attn_ref[n] = jnp.mean(p[n * H:(n + 1) * H], axis=0).astype(attn_ref.dtype)

    # --- context, lane-concat heads, single out-projection -------------------
    ctx = jnp.einsum('bqk,bkd->bqd', p, vg,
                     preferred_element_type=jnp.float32)                # (N*H, L, HD)
    ctx_rows = jnp.concatenate(
        [jnp.concatenate([ctx[n * H + h] for h in range(H)], axis=1)    # (L, E)
         for n in range(N)], axis=0)                                    # (N*L, E)

    att = jnp.dot(ctx_rows, wo_ref[...],
                  preferred_element_type=jnp.float32) + bo              # (N*L, E)

    # --- residual + LN1 + FFN(relu) + residual + LN2 (dropouts identity) -----
    y = _layernorm(x + att, ln1w, ln1b)
    h1 = jnp.maximum(
        jnp.dot(y, w1_ref[...], preferred_element_type=jnp.float32) + b1_ref[...],
        0.0)
    z = jnp.dot(h1, w2_ref[...], preferred_element_type=jnp.float32) + b2
    y2 = _layernorm(y + z, ln2w, ln2b)                                  # (N*L, E)

    # Re-interleave batch-major rows back to the native (L, N*E) layout.
    out_ref[...] = jnp.concatenate(
        [y2[b * L:(b + 1) * L, :] for b in range(N)], axis=1).astype(out_ref.dtype)


# ----------------------------- parameter prep (run ONCE) ----------------------
def prepare_params(params):
    """Hoisted weight re-layouts: run once when the module is loaded."""
    E, H, HD, F = D_MODEL, NHEAD, HEAD_DIM, DIM_FF
    scale = 1.0 / math.sqrt(HD)

    wqkv_t = params["in_proj_weight"].T                       # (E, 3E), cols [q|k|v]
    wqkv_t = wqkv_t.at[:, :E].multiply(scale)                 # fold softmax scale into Wq
    bqkv = params["in_proj_bias"]
    bqkv = bqkv.at[:E].multiply(scale).reshape(1, 3 * E)      # ... and into bq

    slab = jnp.zeros((8, E), jnp.float32)
    slab = slab.at[0].set(params["out_proj_bias"])
    slab = slab.at[1].set(params["ln1_w"])
    slab = slab.at[2].set(params["ln1_b"])
    slab = slab.at[3].set(params["b2"])
    slab = slab.at[4].set(params["ln2_w"])
    slab = slab.at[5].set(params["ln2_b"])

    return dict(
        wqkv_t=wqkv_t,
        bqkv=bqkv,
        wo_t=params["out_proj_weight"].T,                     # (E, E)
        w1_t=params["w1"].T,                                  # (E, F)
        b1=params["b1"].reshape(1, F),
        w2_t=params["w2"].T,                                  # (F, E)
        vec_slab=slab,
    )


# ----------------------------- wrapper ----------------------------------------
@jax.jit
def spatial_msm_layer(src, prep):
    """src: (L, N, E) float32.  Returns (out (L, N, E), attn (N, L, L))."""
    L, N, E = src.shape
    assert (L, N, E) == (SEQ, BATCH, D_MODEL)
    F = DIM_FF

    # Free, contiguous reshape — no transpose, no extra HBM round trip.
    x2 = src.reshape(L, N * E)

    R = N * L
    flops = 2 * (R * E * 3 * E                       # qkv projection
                 + N * NHEAD * 2 * L * L * HEAD_DIM  # scores + context
                 + R * E * E                         # out projection
                 + 2 * R * E * F)                    # FFN
    transcendentals = N * NHEAD * L * L + 2 * R      # exp + 2x rsqrt
    bytes_accessed = 4 * (2 * L * N * E + N * L * L
                          + E * 3 * E + E * E + E * F + F * E
                          + 3 * E + F + 8 * E)
    cost = pl.CostEstimate(flops=flops, transcendentals=transcendentals,
                           bytes_accessed=bytes_accessed)

    vmem = pl.BlockSpec(memory_space=pltpu.MemorySpace.VMEM)

    out2, attn_w = pl.pallas_call(
        fused_layer_kernel,
        out_shape=(
            jax.ShapeDtypeStruct((L, N * E), jnp.float32),
            jax.ShapeDtypeStruct((N, L, L), jnp.float32),
        ),
        in_specs=[vmem] * 8,
        out_specs=(vmem, vmem),
        cost_estimate=cost,
    )(
        x2,
        prep["wqkv_t"], prep["wo_t"], prep["w1_t"], prep["w2_t"],
        prep["bqkv"], prep["b1"], prep["vec_slab"],
    )

    return out2.reshape(L, N, E), attn_w            # free reshape back to (L, N, E)


# ----------------------------- pure-JAX reference -----------------------------
def reference(src, params):
    L, N, E = src.shape
    hp = "highest"
    x = jnp.transpose(src, (1, 0, 2))              # (N, L, E)
    qkv = jnp.einsum("nle,fe->nlf", x, params["in_proj_weight"],
                     precision=hp) + params["in_proj_bias"]
    q, k, v = jnp.split(qkv, 3, axis=-1)
    q = q.reshape(N, L, NHEAD, HEAD_DIM).transpose(0, 2, 1, 3)
    k = k.reshape(N, L, NHEAD, HEAD_DIM).transpose(0, 2, 1, 3)
    v = v.reshape(N, L, NHEAD, HEAD_DIM).transpose(0, 2, 1, 3)
    s = jnp.einsum("nhqd,nhkd->nhqk", q, k, precision=hp) / math.sqrt(HEAD_DIM)
    p = jax.nn.softmax(s, axis=-1)
    ctx = jnp.einsum("nhqk,nhkd->nhqd", p, v,
                     precision=hp).transpose(0, 2, 1, 3).reshape(N, L, E)
    attn_out = jnp.einsum("nle,fe->nlf", ctx, params["out_proj_weight"],
                          precision=hp) + params["out_proj_bias"]
    attn_w = jnp.mean(p, axis=1)                   # (N, L, L)

    def ln(x, w, b):
        m = jnp.mean(x, -1, keepdims=True)
        va = jnp.mean((x - m) ** 2, -1, keepdims=True)
        return (x - m) / jnp.sqrt(va + LN_EPS) * w + b

    y = src + jnp.transpose(attn_out, (1, 0, 2))
    y = ln(y, params["ln1_w"], params["ln1_b"])
    h = jnp.maximum(jnp.einsum("lne,fe->lnf", y, params["w1"], precision=hp)
                    + params["b1"], 0.0)
    z = jnp.einsum("lnf,ef->lne", h, params["w2"], precision=hp) + params["b2"]
    y = ln(y + z, params["ln2_w"], params["ln2_b"])
    return y, attn_w


# ----------------------------- main -------------------------------------------
if __name__ == "__main__":
    key = jax.random.PRNGKey(0)
    ks = jax.random.split(key, 10)

    params = {
        "in_proj_weight": 0.1 * jax.random.normal(ks[0], (3 * D_MODEL, D_MODEL), jnp.float32),
        "in_proj_bias":   0.05 * jax.random.normal(ks[1], (3 * D_MODEL,), jnp.float32),
        "out_proj_weight": 0.1 * jax.random.normal(ks[2], (D_MODEL, D_MODEL), jnp.float32),
        "out_proj_bias":   0.05 * jax.random.normal(ks[3], (D_MODEL,), jnp.float32),
        "w1": 0.1 * jax.random.normal(ks[4], (DIM_FF, D_MODEL), jnp.float32),
        "b1": 0.05 * jax.random.normal(ks[5], (DIM_FF,), jnp.float32),
        "w2": 0.1 * jax.random.normal(ks[6], (D_MODEL, DIM_FF), jnp.float32),
        "b2": 0.05 * jax.random.normal(ks[7], (D_MODEL,), jnp.float32),
        "ln1_w": jnp.ones((D_MODEL,), jnp.float32),
        "ln1_b": jnp.zeros((D_MODEL,), jnp.float32),
        "ln2_w": jnp.ones((D_MODEL,), jnp.float32),
        "ln2_b": jnp.zeros((D_MODEL,), jnp.float32),
    }

    src = jax.random.normal(ks[8], (SEQ, BATCH, D_MODEL), jnp.float32)

    # Weight re-layouts run once, outside the per-call jitted path.
    prep = prepare_params(params)

    out, attn = spatial_msm_layer(src, prep)
    out = jax.block_until_ready(out)
    attn = jax.block_until_ready(attn)

    ref_out, ref_attn = reference(src, params)
    # Exact softmax divide in-kernel -> much tighter parity than the previous
    # approx-reciprocal version (which needed 2e-3).
    np.testing.assert_allclose(np.asarray(attn), np.asarray(ref_attn), atol=5e-4, rtol=5e-4)
    np.testing.assert_allclose(np.asarray(out), np.asarray(ref_out), atol=1e-3, rtol=1e-3)

    print("KERNEL_OK")
</pallas_src>

<mosaic_0001>
module attributes {stable_mosaic.version = 11 : i64} {
  func.func @fused_layer_kernel(%arg0: memref<8x64xf32, #tpu.memory_space<vmem>>, %arg1: memref<32x96xf32, #tpu.memory_space<vmem>>, %arg2: memref<32x32xf32, #tpu.memory_space<vmem>>, %arg3: memref<32x64xf32, #tpu.memory_space<vmem>>, %arg4: memref<64x32xf32, #tpu.memory_space<vmem>>, %arg5: memref<1x96xf32, #tpu.memory_space<vmem>>, %arg6: memref<1x64xf32, #tpu.memory_space<vmem>>, %arg7: memref<8x32xf32, #tpu.memory_space<vmem>>, %arg8: memref<8x64xf32, #tpu.memory_space<vmem>>, %arg9: memref<2x8x8xf32, #tpu.memory_space<vmem>>) attributes {dimension_semantics = [], scalar_prefetch = 0 : i64, scratch_operands = 0 : i64, tpu.core_type = #tpu.core_type<tc>} {
    %c0 = arith.constant 0 : index
    %c0_0 = arith.constant 0 : index
    %0 = vector.load %arg0[%c0, %c0_0] : memref<8x64xf32, #tpu.memory_space<vmem>>, vector<8x64xf32>
    %1 = vector.extract_strided_slice %0 {offsets = [0, 0], sizes = [8, 32], strides = [1, 1]} : vector<8x64xf32> to vector<8x32xf32>
    %2 = vector.extract_strided_slice %0 {offsets = [0, 32], sizes = [8, 32], strides = [1, 1]} : vector<8x64xf32> to vector<8x32xf32>
    %3 = tpu.concatenate %1, %2 in 0 : vector<8x32xf32>, vector<8x32xf32> -> vector<16x32xf32>
    %c0_1 = arith.constant 0 : index
    %c0_2 = arith.constant 0 : index
    %4 = vector.load %arg7[%c0_1, %c0_2] : memref<8x32xf32, #tpu.memory_space<vmem>>, vector<8x32xf32>
    %5 = vector.extract_strided_slice %4 {offsets = [0, 0], sizes = [1, 32], strides = [1, 1]} : vector<8x32xf32> to vector<1x32xf32>
    %6 = vector.extract_strided_slice %4 {offsets = [1, 0], sizes = [1, 32], strides = [1, 1]} : vector<8x32xf32> to vector<1x32xf32>
    %7 = vector.extract_strided_slice %4 {offsets = [2, 0], sizes = [1, 32], strides = [1, 1]} : vector<8x32xf32> to vector<1x32xf32>
    %8 = vector.extract_strided_slice %4 {offsets = [3, 0], sizes = [1, 32], strides = [1, 1]} : vector<8x32xf32> to vector<1x32xf32>
    %9 = vector.extract_strided_slice %4 {offsets = [4, 0], sizes = [1, 32], strides = [1, 1]} : vector<8x32xf32> to vector<1x32xf32>
    %10 = vector.extract_strided_slice %4 {offsets = [5, 0], sizes = [1, 32], strides = [1, 1]} : vector<8x32xf32> to vector<1x32xf32>
    %c0_3 = arith.constant 0 : index
    %c0_4 = arith.constant 0 : index
    %11 = vector.load %arg1[%c0_3, %c0_4] : memref<32x96xf32, #tpu.memory_space<vmem>>, vector<32x96xf32>
    %cst = arith.constant dense<0.000000e+00> : vector<16x96xf32>
    %12 = tpu.matmul %3, %11, %cst {dimension_numbers = #tpu.dot_dimension_numbers<[1], [0], [0], [1], [0, 0, 1, 1], [], []>} : vector<16x32xf32>, vector<32x96xf32>, vector<16x96xf32> -> vector<16x96xf32>
    %c0_5 = arith.constant 0 : index
    %c0_6 = arith.constant 0 : index
    %13 = vector.load %arg5[%c0_5, %c0_6] : memref<1x96xf32, #tpu.memory_space<vmem>>, vector<1x96xf32>
    %14 = vector.broadcast %13 : vector<1x96xf32> to vector<16x96xf32>
    %15 = arith.addf %12, %14 : vector<16x96xf32>
    %16 = vector.extract_strided_slice %15 {offsets = [0, 0], sizes = [8, 8], strides = [1, 1]} : vector<16x96xf32> to vector<8x8xf32>
    %17 = vector.extract_strided_slice %15 {offsets = [0, 8], sizes = [8, 8], strides = [1, 1]} : vector<16x96xf32> to vector<8x8xf32>
    %18 = vector.extract_strided_slice %15 {offsets = [0, 16], sizes = [8, 8], strides = [1, 1]} : vector<16x96xf32> to vector<8x8xf32>
    %19 = vector.extract_strided_slice %15 {offsets = [0, 24], sizes = [8, 8], strides = [1, 1]} : vector<16x96xf32> to vector<8x8xf32>
    %20 = vector.extract_strided_slice %15 {offsets = [8, 0], sizes = [8, 8], strides = [1, 1]} : vector<16x96xf32> to vector<8x8xf32>
    %21 = vector.extract_strided_slice %15 {offsets = [8, 8], sizes = [8, 8], strides = [1, 1]} : vector<16x96xf32> to vector<8x8xf32>
    %22 = vector.extract_strided_slice %15 {offsets = [8, 16], sizes = [8, 8], strides = [1, 1]} : vector<16x96xf32> to vector<8x8xf32>
    %23 = vector.extract_strided_slice %15 {offsets = [8, 24], sizes = [8, 8], strides = [1, 1]} : vector<16x96xf32> to vector<8x8xf32>
    %24 = vector.shape_cast %16 : vector<8x8xf32> to vector<1x8x8xf32>
    %25 = vector.shape_cast %17 : vector<8x8xf32> to vector<1x8x8xf32>
    %26 = vector.shape_cast %18 : vector<8x8xf32> to vector<1x8x8xf32>
    %27 = vector.shape_cast %19 : vector<8x8xf32> to vector<1x8x8xf32>
    %28 = vector.shape_cast %20 : vector<8x8xf32> to vector<1x8x8xf32>
    %29 = vector.shape_cast %21 : vector<8x8xf32> to vector<1x8x8xf32>
    %30 = vector.shape_cast %22 : vector<8x8xf32> to vector<1x8x8xf32>
    %31 = vector.shape_cast %23 : vector<8x8xf32> to vector<1x8x8xf32>
    %32 = tpu.concatenate %24, %25, %26, %27, %28, %29, %30, %31 in 0 : vector<1x8x8xf32>, vector<1x8x8xf32>, vector<1x8x8xf32>, vector<1x8x8xf32>, vector<1x8x8xf32>, vector<1x8x8xf32>, vector<1x8x8xf32>, vector<1x8x8xf32> -> vector<8x8x8xf32>
    %33 = vector.extract_strided_slice %15 {offsets = [0, 32], sizes = [8, 8], strides = [1, 1]} : vector<16x96xf32> to vector<8x8xf32>
    %34 = vector.extract_strided_slice %15 {offsets = [0, 40], sizes = [8, 8], strides = [1, 1]} : vector<16x96xf32> to vector<8x8xf32>
    %35 = vector.extract_strided_slice %15 {offsets = [0, 48], sizes = [8, 8], strides = [1, 1]} : vector<16x96xf32> to vector<8x8xf32>
    %36 = vector.extract_strided_slice %15 {offsets = [0, 56], sizes = [8, 8], strides = [1, 1]} : vector<16x96xf32> to vector<8x8xf32>
    %37 = vector.extract_strided_slice %15 {offsets = [8, 32], sizes = [8, 8], strides = [1, 1]} : vector<16x96xf32> to vector<8x8xf32>
    %38 = vector.extract_strided_slice %15 {offsets = [8, 40], sizes = [8, 8], strides = [1, 1]} : vector<16x96xf32> to vector<8x8xf32>
    %39 = vector.extract_strided_slice %15 {offsets = [8, 48], sizes = [8, 8], strides = [1, 1]} : vector<16x96xf32> to vector<8x8xf32>
    %40 = vector.extract_strided_slice %15 {offsets = [8, 56], sizes = [8, 8], strides = [1, 1]} : vector<16x96xf32> to vector<8x8xf32>
    %41 = vector.shape_cast %33 : vector<8x8xf32> to vector<1x8x8xf32>
    %42 = vector.shape_cast %34 : vector<8x8xf32> to vector<1x8x8xf32>
    %43 = vector.shape_cast %35 : vector<8x8xf32> to vector<1x8x8xf32>
    %44 = vector.shape_cast %36 : vector<8x8xf32> to vector<1x8x8xf32>
    %45 = vector.shape_cast %37 : vector<8x8xf32> to vector<1x8x8xf32>
    %46 = vector.shape_cast %38 : vector<8x8xf32> to vector<1x8x8xf32>
    %47 = vector.shape_cast %39 : vector<8x8xf32> to vector<1x8x8xf32>
    %48 = vector.shape_cast %40 : vector<8x8xf32> to vector<1x8x8xf32>
    %49 = tpu.concatenate %41, %42, %43, %44, %45, %46, %47, %48 in 0 : vector<1x8x8xf32>, vector<1x8x8xf32>, vector<1x8x8xf32>, vector<1x8x8xf32>, vector<1x8x8xf32>, vector<1x8x8xf32>, vector<1x8x8xf32>, vector<1x8x8xf32> -> vector<8x8x8xf32>
    %50 = vector.extract_strided_slice %15 {offsets = [0, 64], sizes = [8, 8], strides = [1, 1]} : vector<16x96xf32> to vector<8x8xf32>
    %51 = vector.extract_strided_slice %15 {offsets = [0, 72], sizes = [8, 8], strides = [1, 1]} : vector<16x96xf32> to vector<8x8xf32>
    %52 = vector.extract_strided_slice %15 {offsets = [0, 80], sizes = [8, 8], strides = [1, 1]} : vector<16x96xf32> to vector<8x8xf32>
    %53 = vector.extract_strided_slice %15 {offsets = [0, 88], sizes = [8, 8], strides = [1, 1]} : vector<16x96xf32> to vector<8x8xf32>
    %54 = vector.extract_strided_slice %15 {offsets = [8, 64], sizes = [8, 8], strides = [1, 1]} : vector<16x96xf32> to vector<8x8xf32>
    %55 = vector.extract_strided_slice %15 {offsets = [8, 72], sizes = [8, 8], strides = [1, 1]} : vector<16x96xf32> to vector<8x8xf32>
    %56 = vector.extract_strided_slice %15 {offsets = [8, 80], sizes = [8, 8], strides = [1, 1]} : vector<16x96xf32> to vector<8x8xf32>
    %57 = vector.extract_strided_slice %15 {offsets = [8, 88], sizes = [8, 8], strides = [1, 1]} : vector<16x96xf32> to vector<8x8xf32>
    %58 = vector.shape_cast %50 : vector<8x8xf32> to vector<1x8x8xf32>
    %59 = vector.shape_cast %51 : vector<8x8xf32> to vector<1x8x8xf32>
    %60 = vector.shape_cast %52 : vector<8x8xf32> to vector<1x8x8xf32>
    %61 = vector.shape_cast %53 : vector<8x8xf32> to vector<1x8x8xf32>
    %62 = vector.shape_cast %54 : vector<8x8xf32> to vector<1x8x8xf32>
    %63 = vector.shape_cast %55 : vector<8x8xf32> to vector<1x8x8xf32>
    %64 = vector.shape_cast %56 : vector<8x8xf32> to vector<1x8x8xf32>
    %65 = vector.shape_cast %57 : vector<8x8xf32> to vector<1x8x8xf32>
    %66 = tpu.concatenate %58, %59, %60, %61, %62, %63, %64, %65 in 0 : vector<1x8x8xf32>, vector<1x8x8xf32>, vector<1x8x8xf32>, vector<1x8x8xf32>, vector<1x8x8xf32>, vector<1x8x8xf32>, vector<1x8x8xf32>, vector<1x8x8xf32> -> vector<8x8x8xf32>
    "tpu.trace_start"() <{level = 10 : i32, message = "bqd,bkd->bqk"}> : () -> ()
    %cst_7 = arith.constant dense<0.000000e+00> : vector<8x8x8xf32>
    %67 = tpu.matmul %32, %49, %cst_7 {dimension_numbers = #tpu.dot_dimension_numbers<[2], [2], [1], [1], [0, 0, 0, 1, 1, 1], [0], [0]>} : vector<8x8x8xf32>, vector<8x8x8xf32>, vector<8x8x8xf32> -> vector<8x8x8xf32>
    "tpu.trace_stop"() : () -> ()
    %cst_8 = arith.constant dense<0xFF800000> : vector<8x8xf32>
    %68 = vector.multi_reduction <maximumf>, %67, %cst_8 [2] : vector<8x8x8xf32> to vector<8x8xf32>
    %69 = vector.shape_cast %68 : vector<8x8xf32> to vector<8x8x1xf32>
    %70 = vector.broadcast %69 : vector<8x8x1xf32> to vector<8x8x8xf32>
    %71 = arith.subf %67, %70 : vector<8x8x8xf32>
    %72 = math.exp %71 : vector<8x8x8xf32>
    %cst_9 = arith.constant dense<0.000000e+00> : vector<8x8xf32>
    %73 = vector.multi_reduction <add>, %72, %cst_9 [2] : vector<8x8x8xf32> to vector<8x8xf32>
    %74 = vector.shape_cast %73 : vector<8x8xf32> to vector<8x8x1xf32>
    %75 = vector.broadcast %74 : vector<8x8x1xf32> to vector<8x8x8xf32>
    %76 = arith.divf %72, %75 : vector<8x8x8xf32>
    %77 = vector.extract_strided_slice %76 {offsets = [0, 0, 0], sizes = [4, 8, 8], strides = [1, 1, 1]} : vector<8x8x8xf32> to vector<4x8x8xf32>
    %cst_10 = arith.constant dense<0.000000e+00> : vector<8x8xf32>
    %78 = vector.multi_reduction <add>, %77, %cst_10 [0] : vector<4x8x8xf32> to vector<8x8xf32>
    %cst_11 = arith.constant 4.000000e+00 : f32
    %79 = vector.broadcast %cst_11 : f32 to vector<8x8xf32>
    %80 = arith.divf %78, %79 : vector<8x8xf32>
    %c0_12 = arith.constant 0 : index
    %c0_13 = arith.constant 0 : index
    %c0_14 = arith.constant 0 : index
    %81 = vector.load %arg9[%c0_12, %c0_13, %c0_14] : memref<2x8x8xf32, #tpu.memory_space<vmem>>, vector<1x8x8xf32>
    %82 = vector.shape_cast %81 : vector<1x8x8xf32> to vector<8x8xf32>
    %83 = vector.shape_cast %80 : vector<8x8xf32> to vector<1x8x8xf32>
    tpu.vector_store %arg9[%c0_12, %c0_13, %c0_14], %83 {strides = array<i32>} : memref<2x8x8xf32, #tpu.memory_space<vmem>>, vector<1x8x8xf32>,
    %84 = vector.extract_strided_slice %76 {offsets = [4, 0, 0], sizes = [4, 8, 8], strides = [1, 1, 1]} : vector<8x8x8xf32> to vector<4x8x8xf32>
    %cst_15 = arith.constant dense<0.000000e+00> : vector<8x8xf32>
    %85 = vector.multi_reduction <add>, %84, %cst_15 [0] : vector<4x8x8xf32> to vector<8x8xf32>
    %cst_16 = arith.constant 4.000000e+00 : f32
    %86 = vector.broadcast %cst_16 : f32 to vector<8x8xf32>
    %87 = arith.divf %85, %86 : vector<8x8xf32>
    %c1 = arith.constant 1 : index
    %c0_17 = arith.constant 0 : index
    %c0_18 = arith.constant 0 : index
    %88 = vector.load %arg9[%c1, %c0_17, %c0_18] : memref<2x8x8xf32, #tpu.memory_space<vmem>>, vector<1x8x8xf32>
    %89 = vector.shape_cast %88 : vector<1x8x8xf32> to vector<8x8xf32>
    %90 = vector.shape_cast %87 : vector<8x8xf32> to vector<1x8x8xf32>
    tpu.vector_store %arg9[%c1, %c0_17, %c0_18], %90 {strides = array<i32>} : memref<2x8x8xf32, #tpu.memory_space<vmem>>, vector<1x8x8xf32>,
    "tpu.trace_start"() <{level = 10 : i32, message = "bqk,bkd->bqd"}> : () -> ()
    %cst_19 = arith.constant dense<0.000000e+00> : vector<8x8x8xf32>
    %91 = tpu.matmul %76, %66, %cst_19 {dimension_numbers = #tpu.dot_dimension_numbers<[2], [1], [1], [2], [0, 0, 0, 1, 1, 2], [0], [0]>} : vector<8x8x8xf32>, vector<8x8x8xf32>, vector<8x8x8xf32> -> vector<8x8x8xf32>
    "tpu.trace_stop"() : () -> ()
    %92 = vector.extract_strided_slice %91 {offsets = [0, 0, 0], sizes = [1, 8, 8], strides = [1, 1, 1]} : vector<8x8x8xf32> to vector<1x8x8xf32>
    %93 = vector.shape_cast %92 : vector<1x8x8xf32> to vector<8x8xf32>
    %94 = vector.extract_strided_slice %91 {offsets = [1, 0, 0], sizes = [1, 8, 8], strides = [1, 1, 1]} : vector<8x8x8xf32> to vector<1x8x8xf32>
    %95 = vector.shape_cast %94 : vector<1x8x8xf32> to vector<8x8xf32>
    %96 = vector.extract_strided_slice %91 {offsets = [2, 0, 0], sizes = [1, 8, 8], strides = [1, 1, 1]} : vector<8x8x8xf32> to vector<1x8x8xf32>
    %97 = vector.shape_cast %96 : vector<1x8x8xf32> to vector<8x8xf32>
    %98 = vector.extract_strided_slice %91 {offsets = [3, 0, 0], sizes = [1, 8, 8], strides = [1, 1, 1]} : vector<8x8x8xf32> to vector<1x8x8xf32>
    %99 = vector.shape_cast %98 : vector<1x8x8xf32> to vector<8x8xf32>
    %100 = tpu.concatenate %93, %95, %97, %99 in 1 : vector<8x8xf32>, vector<8x8xf32>, vector<8x8xf32>, vector<8x8xf32> -> vector<8x32xf32>
    %101 = vector.extract_strided_slice %91 {offsets = [4, 0, 0], sizes = [1, 8, 8], strides = [1, 1, 1]} : vector<8x8x8xf32> to vector<1x8x8xf32>
    %102 = vector.shape_cast %101 : vector<1x8x8xf32> to vector<8x8xf32>
    %103 = vector.extract_strided_slice %91 {offsets = [5, 0, 0], sizes = [1, 8, 8], strides = [1, 1, 1]} : vector<8x8x8xf32> to vector<1x8x8xf32>
    %104 = vector.shape_cast %103 : vector<1x8x8xf32> to vector<8x8xf32>
    %105 = vector.extract_strided_slice %91 {offsets = [6, 0, 0], sizes = [1, 8, 8], strides = [1, 1, 1]} : vector<8x8x8xf32> to vector<1x8x8xf32>
    %106 = vector.shape_cast %105 : vector<1x8x8xf32> to vector<8x8xf32>
    %107 = vector.extract_strided_slice %91 {offsets = [7, 0, 0], sizes = [1, 8, 8], strides = [1, 1, 1]} : vector<8x8x8xf32> to vector<1x8x8xf32>
    %108 = vector.shape_cast %107 : vector<1x8x8xf32> to vector<8x8xf32>
    %109 = tpu.concatenate %102, %104, %106, %108 in 1 : vector<8x8xf32>, vector<8x8xf32>, vector<8x8xf32>, vector<8x8xf32> -> vector<8x32xf32>
    %110 = tpu.concatenate %100, %109 in 0 : vector<8x32xf32>, vector<8x32xf32> -> vector<16x32xf32>
    %c0_20 = arith.constant 0 : index
    %c0_21 = arith.constant 0 : index
    %111 = vector.load %arg2[%c0_20, %c0_21] : memref<32x32xf32, #tpu.memory_space<vmem>>, vector<32x32xf32>
    %cst_22 = arith.constant dense<0.000000e+00> : vector<16x32xf32>
    %112 = tpu.matmul %110, %111, %cst_22 {dimension_numbers = #tpu.dot_dimension_numbers<[1], [0], [0], [1], [0, 0, 1, 1], [], []>} : vector<16x32xf32>, vector<32x32xf32>, vector<16x32xf32> -> vector<16x32xf32>
    %113 = vector.broadcast %5 : vector<1x32xf32> to vector<16x32xf32>
    %114 = arith.addf %112, %113 : vector<16x32xf32>
    %115 = arith.addf %3, %114 : vector<16x32xf32>
    %cst_23 = arith.constant dense<0.000000e+00> : vector<16xf32>
    %116 = vector.multi_reduction <add>, %115, %cst_23 [1] : vector<16x32xf32> to vector<16xf32>
    %117 = vector.shape_cast %116 : vector<16xf32> to vector<16x1xf32>
    %cst_24 = arith.constant 3.200000e+01 : f32
    %118 = vector.broadcast %cst_24 : f32 to vector<16x1xf32>
    %119 = arith.divf %117, %118 : vector<16x1xf32>
    %120 = vector.broadcast %119 : vector<16x1xf32> to vector<16x32xf32>
    %121 = arith.subf %115, %120 : vector<16x32xf32>
    %122 = arith.mulf %121, %121 : vector<16x32xf32>
    %cst_25 = arith.constant dense<0.000000e+00> : vector<16xf32>
    %123 = vector.multi_reduction <add>, %122, %cst_25 [1] : vector<16x32xf32> to vector<16xf32>
    %124 = vector.shape_cast %123 : vector<16xf32> to vector<16x1xf32>
    %cst_26 = arith.constant 3.200000e+01 : f32
    %125 = vector.broadcast %cst_26 : f32 to vector<16x1xf32>
    %126 = arith.divf %124, %125 : vector<16x1xf32>
    %cst_27 = arith.constant 9.99999974E-6 : f32
    %127 = vector.broadcast %cst_27 : f32 to vector<16x1xf32>
    %128 = arith.addf %126, %127 : vector<16x1xf32>
    %129 = math.rsqrt %128 : vector<16x1xf32>
    %130 = vector.broadcast %129 : vector<16x1xf32> to vector<16x32xf32>
    %131 = arith.mulf %121, %130 : vector<16x32xf32>
    %132 = vector.broadcast %6 : vector<1x32xf32> to vector<16x32xf32>
    %133 = arith.mulf %131, %132 : vector<16x32xf32>
    %134 = vector.broadcast %7 : vector<1x32xf32> to vector<16x32xf32>
    %135 = arith.addf %133, %134 : vector<16x32xf32>
    %c0_28 = arith.constant 0 : index
    %c0_29 = arith.constant 0 : index
    %136 = vector.load %arg3[%c0_28, %c0_29] : memref<32x64xf32, #tpu.memory_space<vmem>>, vector<32x64xf32>
    %cst_30 = arith.constant dense<0.000000e+00> : vector<16x64xf32>
    %137 = tpu.matmul %135, %136, %cst_30 {dimension_numbers = #tpu.dot_dimension_numbers<[1], [0], [0], [1], [0, 0, 1, 1], [], []>} : vector<16x32xf32>, vector<32x64xf32>, vector<16x64xf32> -> vector<16x64xf32>
    %c0_31 = arith.constant 0 : index
    %c0_32 = arith.constant 0 : index
    %138 = vector.load %arg6[%c0_31, %c0_32] : memref<1x64xf32, #tpu.memory_space<vmem>>, vector<1x64xf32>
    %139 = vector.broadcast %138 : vector<1x64xf32> to vector<16x64xf32>
    %140 = arith.addf %137, %139 : vector<16x64xf32>
    %cst_33 = arith.constant 0.000000e+00 : f32
    %141 = vector.broadcast %cst_33 : f32 to vector<16x64xf32>
    %142 = arith.maximumf %140, %141 : vector<16x64xf32>
    %c0_34 = arith.constant 0 : index
    %c0_35 = arith.constant 0 : index
    %143 = vector.load %arg4[%c0_34, %c0_35] : memref<64x32xf32, #tpu.memory_space<vmem>>, vector<64x32xf32>
    %cst_36 = arith.constant dense<0.000000e+00> : vector<16x32xf32>
    %144 = tpu.matmul %142, %143, %cst_36 {dimension_numbers = #tpu.dot_dimension_numbers<[1], [0], [0], [1], [0, 0, 1, 1], [], []>} : vector<16x64xf32>, vector<64x32xf32>, vector<16x32xf32> -> vector<16x32xf32>
    %145 = vector.broadcast %8 : vector<1x32xf32> to vector<16x32xf32>
    %146 = arith.addf %144, %145 : vector<16x32xf32>
    %147 = arith.addf %135, %146 : vector<16x32xf32>
    %cst_37 = arith.constant dense<0.000000e+00> : vector<16xf32>
    %148 = vector.multi_reduction <add>, %147, %cst_37 [1] : vector<16x32xf32> to vector<16xf32>
    %149 = vector.shape_cast %148 : vector<16xf32> to vector<16x1xf32>
    %cst_38 = arith.constant 3.200000e+01 : f32
    %150 = vector.broadcast %cst_38 : f32 to vector<16x1xf32>
    %151 = arith.divf %149, %150 : vector<16x1xf32>
    %152 = vector.broadcast %151 : vector<16x1xf32> to vector<16x32xf32>
    %153 = arith.subf %147, %152 : vector<16x32xf32>
    %154 = arith.mulf %153, %153 : vector<16x32xf32>
    %cst_39 = arith.constant dense<0.000000e+00> : vector<16xf32>
    %155 = vector.multi_reduction <add>, %154, %cst_39 [1] : vector<16x32xf32> to vector<16xf32>
    %156 = vector.shape_cast %155 : vector<16xf32> to vector<16x1xf32>
    %cst_40 = arith.constant 3.200000e+01 : f32
    %157 = vector.broadcast %cst_40 : f32 to vector<16x1xf32>
    %158 = arith.divf %156, %157 : vector<16x1xf32>
    %cst_41 = arith.constant 9.99999974E-6 : f32
    %159 = vector.broadcast %cst_41 : f32 to vector<16x1xf32>
    %160 = arith.addf %158, %159 : vector<16x1xf32>
    %161 = math.rsqrt %160 : vector<16x1xf32>
    %162 = vector.broadcast %161 : vector<16x1xf32> to vector<16x32xf32>
    %163 = arith.mulf %153, %162 : vector<16x32xf32>
    %164 = vector.broadcast %9 : vector<1x32xf32> to vector<16x32xf32>
    %165 = arith.mulf %163, %164 : vector<16x32xf32>
    %166 = vector.broadcast %10 : vector<1x32xf32> to vector<16x32xf32>
    %167 = arith.addf %165, %166 : vector<16x32xf32>
    %168 = vector.extract_strided_slice %167 {offsets = [0, 0], sizes = [8, 32], strides = [1, 1]} : vector<16x32xf32> to vector<8x32xf32>
    %169 = vector.extract_strided_slice %167 {offsets = [8, 0], sizes = [8, 32], strides = [1, 1]} : vector<16x32xf32> to vector<8x32xf32>
    %170 = tpu.concatenate %168, %169 in 1 : vector<8x32xf32>, vector<8x32xf32> -> vector<8x64xf32>
    %c0_42 = arith.constant 0 : index
    %c0_43 = arith.constant 0 : index
    %171 = vector.load %arg8[%c0_42, %c0_43] : memref<8x64xf32, #tpu.memory_space<vmem>>, vector<8x64xf32>
    tpu.vector_store %arg8[%c0_42, %c0_43], %170 {strides = array<i32>} : memref<8x64xf32, #tpu.memory_space<vmem>>, vector<8x64xf32>,
    return
  }
}

</mosaic_0001>

<bundles_post_ra>
// kernel: spatial_msm_layer.1
= control target key start
LH: loop header
LB: loop body
LE: loop exit
PB: predicated region body
PF: predicated region fallthrough
CT: control target
= control target key end

     0   :  { %15 = vsyncpa [#allocation3], 0  ;;  %s2625_s0 = inlined_call_operand.vmem [shape: f32[8,64], index: 0, kind: input, shape index: {}]   ;;  %s2626_s1 = inlined_call_operand.vmem [shape: f32[32,96], index: 1, kind: input, shape index: {}]   ;;  %s2627_s2 = inlined_call_operand.vmem [shape: f32[32,32], index: 2, kind: input, shape index: {}]   ;;  %s2628_s3 = inlined_call_operand.vmem [shape: f32[32,64], index: 3, kind: input, shape index: {}]   ;;  %s2629_s4 = inlined_call_operand.vmem [shape: f32[64,32], index: 4, kind: input, shape index: {}]   ;;  %s2630_s5 = inlined_call_operand.vmem [shape: f32[1,96], index: 5, kind: input, shape index: {}]   ;;  %s2631_s6 = inlined_call_operand.hbm [shape: f32[1,64], index: 6, kind: input, shape index: {}]   ;;  %s2632_s7 = inlined_call_operand.hbm [shape: f32[8,32], index: 7, kind: input, shape index: {}]   ;;  %s2633_s8 = inlined_call_operand.vmem [shape: f32[8,64], index: 8, kind: output, shape index: {0}]   ;;  %s2634_s9 = inlined_call_operand.hbm [shape: f32[2,8,8], index: 9, kind: output, shape index: {1}]  }
   0x1   :  { %16 = vsyncpa [#allocation6], 0 }
   0x2   :  { %17 = vsyncpa [#allocation4], 0  ;;  %s2257_s30 = smov [#allocation2]   ;;  %s2258_s11 = smov [#allocation5]  }
   0x3   :  { %s36_s10 = sshll.u32 %s2257_s30, 4  ;;  %s46_s12 = sshll.u32 %s2258_s11, 4  ;;  %s37_s10 = int_to_ptr.vmem [resolvable:$true] %s36_s10  ;;  %s47_s12 = int_to_ptr.vmem [resolvable:$true] %s46_s12 }
   0x4   :  { %s2199_s13 = scalar_lea.vmem %s37_s10, 16  ;;  %s2203_s14 = scalar_lea.vmem %s37_s10, 32 }
   0x5   :  { %p2200_p0 = scmp.ne.s32.totalorder %s37_s10, %s2199_s13  ;;  %p2204_p1 = scmp.lt.s32.totalorder %s37_s10, %s37_s10 }
   0x6   :  { %p2205_p2 = scmp.lt.s32.totalorder %s2203_s14, %s2199_s13 }
   0x8   :  { %p2206_p3 = por %p2205_p2, %p2204_p1 }
   0xa   :  { %p2207_p4 = pnand %p2206_p3, %p2200_p0 }
   0xc   :  { %2210 = shalt.err (!%p2207_p4)
}
   0xd   :  { %39 = dma.hbm_to_vmem [thread:$0]  %s2631_s6, 16, %s37_s10, [#allocation3]  }
   0xe   :  { %s2219_s17 = scalar_lea.vmem %s47_s12, 128  ;;  %p2224_p6 = scmp.lt.s32.totalorder %s47_s12, %s47_s12 }
   0xf   :  { %p2220_p5 = scmp.ne.s32.totalorder %s47_s12, %s2219_s17  ;;  %p2225_p7 = scmp.lt.s32.totalorder %s2219_s17, %s2219_s17 }
  0x11   :  { %p2226_p8 = por %p2225_p7, %p2224_p6 }
  0x13   :  { %p2227_p9 = pnand %p2226_p8, %p2220_p5 }
  0x15   :  { %2230 = shalt.err (!%p2227_p9)
}
  0x16   :  { %49 = dma.hbm_to_vmem [thread:$0]  %s2632_s7, 128, %s47_s12, [#allocation6]  }
  0x17   :  { %2251 = dma.done.wait [#allocation3], 16  }
  0x18   :  { %2252 = vsyncadd [#allocation3], 4294967280 }
  0x19   :  { %2253 = dma.done.wait [#allocation6], 128  }
  0x1a   :  { %2254 = vsyncadd [#allocation6], 4294967168  ;;  %vm73_vm0 = vcmask 261120   ;;  %v2331_v0 = vld [vmem:[%s2625_s0] sm:$0xff]  ;;  %v65_v1 = vld [vmem:[%s2626_s1 + $0x18] sm:$0xff]  ;;  %s2259_s25 = smov 96  }
  0x1b   :  { %v64_v2 = vld [vmem:[%s2626_s1 + $0x10] sm:$0xff]  ;;  %58 = vrot.lane.b32.xlu0 %v2331_v0, %s2259_s25  ;;  %2004 = vmatprep.subr.mxu1 %v65_v1  ;;  %v63_v3 = vld [vmem:[%s2626_s1 + $0x8] sm:$0xff]  ;;  %v62_v4 = vld [vmem:[%s2626_s1] sm:$0xff]  ;;  %v2260_v7 = vmov 0.0   ;;  %s2261_s1 = smov 112   ;;  %s2262_s30 = smov 120  }
  0x1c   :  { %2005 = vmatpush3.msra.mxu1 %v65_v1  ;;  %2012 = vmatprep.mubr.msk.f32.mxu1 %vm73_vm0, %v2331_v0  ;;  %v1910_v8 = vld [vmem:[%s2630_s5] ss:$0 sm:$0xff]  ;;  %vm2263_vm1 = vmmov 0   ;;  %s2264_s10 = smov 104   ;;  %vm169_vm2 = vcmask 64512   ;;  %s2265_s5 = smov 64  }
  0x1d   :  { %2006 = vmatprep.subr.mxu1 %v64_v2  ;;  %2025 = vmatprep.subr.mxu0 %v2260_v7  ;;  %s2266_s17 = smov 8   ;;  %s2267_s20 = smov 16   ;;  %vm1505_vm3 = vcmask 130048   ;;  %vm1507_vm4 = vcmask 195584   ;;  %vm1760_vm5 = vcmask 523264  }
  0x1e   :  { %2007 = vmatpush3.msra.mxu1 %v64_v2  ;;  %2027 = vmatprep.mubr.msk.f32.mxu0 %vm2263_vm1, %v2260_v7  ;;  %s2268_s21 = smov 24  }
  0x1f   :  { %2008 = vmatprep.subr.mxu1 %v63_v3 }
  0x20   :  { %2009 = vmatpush3.msra.mxu1 %v63_v3 }
  0x21   :  { %2010 = vmatprep.subr.mxu1 %v62_v4 }
  0x22   :  { %2011 = vmatpush3.msra.mxu1 %v62_v4 }
  0x23   :  { %2015 = vmatprep.subr.mxu1 %v2260_v7 }
  0x8d   :  { %v2349_v5 = vpop.permute.xlu0 %58 }
  0x8e   :  { %2013 = vmatmul.mubr.msk.f32.vlgmr.msra.gmra.mxu1 %vm73_vm0, %v2349_v5 }
  0x8f   :  { %2017 = vmatprep.mubr.msk.f32.mxu1 %vm2263_vm1, %v2260_v7 }
 0x14e   :  { %v2014_v6 = vpop.f32.mrf.mxu1 }
 0x14f   :  { %v2366_v11 = vadd.f32 %v2014_v6, %v1910_v8 }
 0x150   :  { %v144_v9 = vpop.f32.mrf.mxu1 }
 0x151   :  { %v2358_v10 = vadd.f32 %v1910_v8, %v144_v9 }
 0x153   :  { %156 = vrot.lane.b32.xlu1 %v2358_v10, %s2261_s1  ;;  %154 = vrot.lane.b32.xlu0 %v2358_v10, %s2262_s30 }
 0x157   :  { %158 = vrot.lane.b32.xlu1 %v2358_v10, %s2264_s10  ;;  %161 = vrot.lane.b32.xlu0 %v2366_v11, %s2262_s30 }
 0x15b   :  { %163 = vrot.lane.b32.xlu1 %v2366_v11, %s2261_s1  ;;  %165 = vrot.lane.b32.xlu0 %v2366_v11, %s2264_s10 }
 0x15f   :  { %167 = vrot.lane.b32.xlu1 %v2358_v10, %s2259_s25 }
 0x1c5   :  { %v2374_v12 = vpop.permute.xlu1 %156  ;;  %v2376_v13 = vpop.permute.xlu0 %154 }
 0x1c6   :  { %320 = vrot.lane.b32.xlu1 %v2374_v12, %s2259_s25  ;;  %244 = vrot.lane.b32.xlu0 %v2376_v13, %s2259_s25 }
 0x1c9   :  { %v2382_v14 = vpop.permute.xlu1 %158  ;;  %v2388_v15 = vpop.permute.xlu0 %161 }
 0x1ca   :  { %472 = vrot.lane.b32.xlu1 %v2366_v11, %s2259_s25  ;;  %396 = vrot.lane.b32.xlu0 %v2382_v14, %s2259_s25 }
 0x1cd   :  { %v2390_v16 = vpop.permute.xlu1 %163  ;;  %v2396_v17 = vpop.permute.xlu0 %165 }
 0x1ce   :  { %624 = vrot.lane.b32.xlu1 %v2390_v16, %s2259_s25  ;;  %548 = vrot.lane.b32.xlu0 %v2388_v15, %s2259_s25 }
 0x1d1   :  { %v168_v18 = vpop.permute.xlu1 %167 }
 0x1d2   :  { %2016 = vmatpush3.xpose.msk.msra.mxu1 %vm169_vm2, %v168_v18  ;;  %700 = vrot.lane.b32.xlu0 %v2396_v17, %s2259_s25 }
 0x1d3   :  { %2020 = vmatprep.subr.mxu1 %v2260_v7 }
 0x1d5   :  { %2018 = vmatmul.mubr.msk.f32.vlgmr.msra.gmra.mxu1 %vm169_vm2, %v2358_v10 }
 0x1d6   :  { %2022 = vmatprep.mubr.msk.f32.mxu1 %vm2263_vm1, %v2260_v7 }
 0x238   :  { %v321_v19 = vpop.permute.xlu1 %320  ;;  %v245_v20 = vpop.permute.xlu0 %244 }
 0x239   :  { %2021 = vmatpush3.xpose.msk.msra.mxu1 %vm169_vm2, %v245_v20  ;;  %2026 = vmatpush3.xpose.msk.msra.mxu0 %vm169_vm2, %v321_v19 }
 0x23a   :  { %2035 = vmatprep.subr.mxu0 %v2260_v7  ;;  %2030 = vmatprep.subr.mxu1 %v2260_v7 }
 0x23c   :  { %2028 = vmatmul.mubr.msk.f32.vlgmr.msra.gmra.mxu0 %vm169_vm2, %v2374_v12  ;;  %v473_v21 = vpop.permute.xlu1 %472  ;;  %2023 = vmatmul.mubr.msk.f32.vlgmr.msra.gmra.mxu1 %vm169_vm2, %v2376_v13  ;;  %v397_v22 = vpop.permute.xlu0 %396 }
 0x23d   :  { %2031 = vmatpush3.xpose.msk.msra.mxu1 %vm169_vm2, %v397_v22  ;;  %2036 = vmatpush3.xpose.msk.msra.mxu0 %vm169_vm2, %v473_v21 }
 0x23e   :  { %2032 = vmatprep.mubr.msk.f32.mxu1 %vm2263_vm1, %v2260_v7  ;;  %2037 = vmatprep.mubr.msk.f32.mxu0 %vm2263_vm1, %v2260_v7 }
 0x23f   :  { %2045 = vmatprep.subr.mxu0 %v2260_v7  ;;  %2040 = vmatprep.subr.mxu1 %v2260_v7 }
 0x240   :  { %2038 = vmatmul.mubr.msk.f32.vlgmr.msra.gmra.mxu0 %vm169_vm2, %v2366_v11  ;;  %v625_v23 = vpop.permute.xlu1 %624  ;;  %2033 = vmatmul.mubr.msk.f32.vlgmr.msra.gmra.mxu1 %vm169_vm2, %v2382_v14  ;;  %v549_v24 = vpop.permute.xlu0 %548 }
 0x241   :  { %2041 = vmatpush3.xpose.msk.msra.mxu1 %vm169_vm2, %v549_v24  ;;  %2046 = vmatpush3.xpose.msk.msra.mxu0 %vm169_vm2, %v625_v23 }
 0x242   :  { %2042 = vmatprep.mubr.msk.f32.mxu1 %vm2263_vm1, %v2260_v7  ;;  %2047 = vmatprep.mubr.msk.f32.mxu0 %vm2263_vm1, %v2260_v7 }
 0x243   :  { %2050 = vmatprep.subr.mxu1 %v2260_v7  ;;  %2055 = vmatprep.subr.mxu0 %v2260_v7 }
 0x244   :  { %2043 = vmatmul.mubr.msk.f32.vlgmr.msra.gmra.mxu1 %vm169_vm2, %v2388_v15  ;;  %2048 = vmatmul.mubr.msk.f32.vlgmr.msra.gmra.mxu0 %vm169_vm2, %v2390_v16  ;;  %v701_v25 = vpop.permute.xlu0 %700 }
 0x245   :  { %2051 = vmatpush3.xpose.msk.msra.mxu1 %vm169_vm2, %v701_v25  ;;  %2052 = vmatprep.mubr.msk.f32.mxu1 %vm2263_vm1, %v2260_v7 }
 0x246   :  { %2060 = vmatprep.subr.mxu1 %v2260_v7  ;;  %2057 = vmatprep.mubr.msk.f32.mxu0 %vm2263_vm1, %v2260_v7 }
 0x248   :  { %2053 = vmatmul.mubr.msk.f32.vlgmr.msra.gmra.mxu1 %vm169_vm2, %v2396_v17 }
 0x249   :  { %2062 = vmatprep.mubr.msk.f32.mxu1 %vm2263_vm1, %v2260_v7 }
 0x295   :  { %v240_v26 = vpop.f32.mrf.mxu1 }
 0x296   :  { %v776_v27 = vsel %vm169_vm2, %v240_v26, -inf }
 0x297   :  { %777 = vmax.xlane.f32.xlu1 %v776_v27  ;;  %v2019_v28 = vpop.f32.mrf.mxu1 }
 0x2fc   :  { %v316_v29 = vpop.f32.mrf.mxu1  ;;  %v392_v30 = vpop.f32.mrf.mxu0 }
 0x2fd   :  { %v779_v31 = vsel %vm169_vm2, %v316_v29, -inf  ;;  %v782_v36 = vsel %vm169_vm2, %v392_v30, -inf }
 0x2fe   :  { %v2029_v32 = vpop.f32.mrf.mxu0  ;;  %780 = vmax.xlane.f32.xlu0 %v779_v31  ;;  %v2024_v33 = vpop.f32.mrf.mxu1 }
 0x300   :  { %v468_v34 = vpop.f32.mrf.mxu1  ;;  %v544_v35 = vpop.f32.mrf.mxu0 }
 0x301   :  { %v785_v37 = vsel %vm169_vm2, %v468_v34, -inf  ;;  %v788_v42 = vsel %vm169_vm2, %v544_v35, -inf }
 0x302   :  { %v2039_v38 = vpop.f32.mrf.mxu0  ;;  %783 = vmax.xlane.f32.xlu0 %v782_v36  ;;  %786 = vmax.xlane.f32.xlu1 %v785_v37  ;;  %v2034_v39 = vpop.f32.mrf.mxu1 }
 0x304   :  { %v620_v40 = vpop.f32.mrf.mxu1  ;;  %v696_v41 = vpop.f32.mrf.mxu0 }
 0x305   :  { %v791_v43 = vsel %vm169_vm2, %v620_v40, -inf  ;;  %v794_v47 = vsel %vm169_vm2, %v696_v41, -inf }
 0x306   :  { %v2049_v44 = vpop.f32.mrf.mxu0  ;;  %789 = vmax.xlane.f32.xlu0 %v788_v42  ;;  %792 = vmax.xlane.f32.xlu1 %v791_v43  ;;  %v2044_v45 = vpop.f32.mrf.mxu1 }
 0x308   :  { %v772_v46 = vpop.f32.mrf.mxu1 }
 0x309   :  { %v797_v48 = vsel %vm169_vm2, %v772_v46, -inf }
 0x30a   :  { %795 = vmax.xlane.f32.xlu0 %v794_v47  ;;  %798 = vmax.xlane.f32.xlu1 %v797_v48  ;;  %v2054_v49 = vpop.f32.mrf.mxu1 }
 0x31b   :  { %960 = vrot.lane.b32.xlu1 %v2376_v13, %s2265_s5 }
 0x31f   :  { %1036 = vrot.lane.b32.xlu1 %v2374_v12, %s2265_s5 }
 0x320   :  { %884 = vrot.lane.b32.xlu0 %v2358_v10, %s2265_s5  ;;  %v778_v50 = vpop.xlane.xlu1 %777 }
 0x321   :  { %v800_v51 = vsub.f32 %v240_v26, %v778_v50 }
 0x323   :  { %1188 = vrot.lane.b32.xlu1 %v2366_v11, %s2265_s5  ;;  %v808_v52 = vmul.f32 1.442695, %v800_v51 }
 0x324   :  { %1112 = vrot.lane.b32.xlu0 %v2382_v14, %s2265_s5 }
 0x325   :  { %2151 = vpow2.f32 %v808_v52 }
 0x328   :  { %1264 = vrot.lane.b32.xlu0 %v2388_v15, %s2265_s5 }
 0x332   :  { %v2468_v53 = vpop.eup %2151 }
 0x333   :  { %v824_v54 = vsel %vm169_vm2, %v2468_v53, 0.0 }
 0x347   :  { %825 = vadd.xlane.f32.xlu0 %v824_v54 }
 0x387   :  { %v781_v55 = vpop.xlane.xlu0 %780 }
 0x388   :  { %v801_v56 = vsub.f32 %v316_v29, %v781_v55 }
 0x38a   :  { %v810_v57 = vmul.f32 1.442695, %v801_v56 }
 0x38b   :  { %v787_v58 = vpop.xlane.xlu1 %786  ;;  %v784_v59 = vpop.xlane.xlu0 %783 }
 0x38c   :  { %2153 = vpow2.f32 %v810_v57  ;;  %v803_v60 = vsub.f32 %v468_v34, %v787_v58  ;;  %v802_v61 = vsub.f32 %v392_v30, %v784_v59 }
 0x38e   :  { %v814_v62 = vmul.f32 1.442695, %v803_v60  ;;  %v812_v63 = vmul.f32 1.442695, %v802_v61 }
 0x38f   :  { %v793_v1 = vpop.xlane.xlu1 %792  ;;  %v790_v2 = vpop.xlane.xlu0 %789 }
 0x390   :  { %2155 = vpow2.f32 %v814_v62  ;;  %v805_v3 = vsub.f32 %v620_v40, %v793_v1  ;;  %v804_v4 = vsub.f32 %v544_v35, %v790_v2 }
 0x391   :  { %2157 = vpow2.f32 %v812_v63 }
 0x392   :  { %v818_v6 = vmul.f32 1.442695, %v805_v3  ;;  %v816_v8 = vmul.f32 1.442695, %v804_v4 }
 0x393   :  { %v799_v9 = vpop.xlane.xlu1 %798  ;;  %v796_v10 = vpop.xlane.xlu0 %795 }
 0x394   :  { %2159 = vpow2.f32 %v818_v6  ;;  %v807_v11 = vsub.f32 %v772_v46, %v799_v9  ;;  %v806_v12 = vsub.f32 %v696_v41, %v796_v10 }
 0x395   :  { %2161 = vpow2.f32 %v816_v8 }
 0x396   :  { %v822_v13 = vmul.f32 1.442695, %v807_v11  ;;  %v820_v14 = vmul.f32 1.442695, %v806_v12 }
 0x397   :  { %v961_v15 = vpop.permute.xlu1 %960  ;;  %v885_v18 = vpop.permute.xlu0 %884 }
 0x398   :  { %2163 = vpow2.f32 %v822_v13  ;;  %2056 = vmatpush3.msra.mxu0 %v885_v18  ;;  %2061 = vmatpush3.msra.mxu1 %v961_v15 }
 0x399   :  { %v2154_v19 = vpop.eup %2153  ;;  %2165 = vpow2.f32 %v820_v14  ;;  %2065 = vmatprep.subr.mxu0 %v2260_v7  ;;  %2070 = vmatprep.subr.mxu1 %v2260_v7 }
 0x39a   :  { %v827_v20 = vsel %vm169_vm2, %v2154_v19, 0.0 }
 0x39b   :  { %828 = vadd.xlane.f32.xlu1 %v827_v20  ;;  %v1113_v33 = vpop.permute.xlu0 %1112  ;;  %v1037_v38 = vpop.permute.xlu1 %1036  ;;  %v1526_v20 = vld [vmem:[%s2627_s2 + $0x10] sm:$0xff] }
 0x39d   :  { %v2156_v21 = vpop.eup %2155 }
 0x39e   :  { %v2158_v22 = vpop.eup %2157  ;;  %v833_v23 = vsel %vm169_vm2, %v2156_v21, 0.0 }
 0x39f   :  { %834 = vadd.xlane.f32.xlu1 %v833_v23  ;;  %v830_v24 = vsel %vm169_vm2, %v2158_v22, 0.0  ;;  %v1265_v34 = vpop.permute.xlu0 %1264  ;;  %v1524_v23 = vld [vmem:[%s2627_s2] sm:$0xff] }
 0x3a0   :  { %831 = vadd.xlane.f32.xlu0 %v830_v24 }
 0x3a1   :  { %v2160_v25 = vpop.eup %2159 }
 0x3a2   :  { %v2477_v26 = vpop.eup %2161  ;;  %v839_v27 = vsel %vm169_vm2, %v2160_v25, 0.0 }
 0x3a3   :  { %840 = vadd.xlane.f32.xlu1 %v839_v27  ;;  %v836_v28 = vsel %vm169_vm2, %v2477_v26, 0.0 }
 0x3a4   :  { %837 = vadd.xlane.f32.xlu0 %v836_v28 }
 0x3a5   :  { %v2482_v29 = vpop.eup %2163 }
 0x3a6   :  { %v2484_v30 = vpop.eup %2165  ;;  %v845_v31 = vsel %vm169_vm2, %v2482_v29, 0.0 }
 0x3a7   :  { %846 = vadd.xlane.f32.xlu1 %v845_v31  ;;  %v842_v32 = vsel %vm169_vm2, %v2484_v30, 0.0 }
 0x3a8   :  { %843 = vadd.xlane.f32.xlu0 %v842_v32 }
 0x3b8   :  { %1340 = vrot.lane.b32.xlu1 %v2390_v16, %s2265_s5  ;;  %v1189_v16 = vpop.permute.xlu1 %1188 }
 0x3be   :  { %1416 = vrot.lane.b32.xlu0 %v2396_v17, %s2265_s5 }
 0x3d0   :  { %v826_v35 = vpop.xlane.xlu0 %825 }
 0x3d1   :  { %2167 = vrcp.f32 %v826_v35 }
 0x3de   :  { %v2168_v36 = vpop.eup %2167 }
 0x3df   :  { %v849_v37 = vmul.f32 %v2168_v36, %v2468_v53 }
 0x3e1   :  { %2058 = vmatmul.mubr.msk.f32.vlgmr.msra.gmra.mxu0 %vm169_vm2, %v849_v37  ;;  %v864_v51 = vsel %vm169_vm2, %v849_v37, 0.0 }
 0x3e2   :  { %2066 = vmatpush3.msra.mxu0 %v1037_v38  ;;  %2067 = vmatprep.mubr.msk.f32.mxu0 %vm2263_vm1, %v2260_v7 }
 0x3e3   :  { %2075 = vmatprep.subr.mxu0 %v2260_v7 }
 0x424   :  { %v829_v39 = vpop.xlane.xlu1 %828 }
 0x425   :  { %2169 = vrcp.f32 %v829_v39 }
 0x428   :  { %v835_v17 = vpop.xlane.xlu1 %834 }
 0x429   :  { %2171 = vrcp.f32 %v835_v17  ;;  %v832_v40 = vpop.xlane.xlu0 %831 }
 0x42a   :  { %2173 = vrcp.f32 %v832_v40 }
 0x42c   :  { %v841_v41 = vpop.xlane.xlu1 %840 }
 0x42d   :  { %2175 = vrcp.f32 %v841_v41  ;;  %v838_v42 = vpop.xlane.xlu0 %837 }
 0x42e   :  { %2177 = vrcp.f32 %v838_v42 }
 0x430   :  { %v847_v43 = vpop.xlane.xlu1 %846 }
 0x431   :  { %2179 = vrcp.f32 %v847_v43  ;;  %v844_v44 = vpop.xlane.xlu0 %843 }
 0x432   :  { %v2170_v45 = vpop.eup %2169  ;;  %2181 = vrcp.f32 %v844_v44 }
 0x433   :  { %v851_v46 = vmul.f32 %v2170_v45, %v2154_v19  ;;  %v1527_v19 = vld [vmem:[%s2627_s2 + $0x18] sm:$0xff] }
 0x434   :  { %v1341_v1 = vpop.permute.xlu1 %1340 }
 0x435   :  { %2063 = vmatmul.mubr.msk.f32.vlgmr.msra.gmra.mxu1 %vm169_vm2, %v851_v46  ;;  %v865_v48 = vsel %vm169_vm2, %v851_v46, 0.0  ;;  %v1417_v61 = vpop.permute.xlu0 %1416 }
 0x436   :  { %v2172_v47 = vpop.eup %2171  ;;  %2071 = vmatpush3.msra.mxu1 %v1113_v33  ;;  %2072 = vmatprep.mubr.msk.f32.mxu1 %vm2263_vm1, %v2260_v7  ;;  %v866_v53 = vadd.f32 %v865_v48, %v864_v51 }
 0x437   :  { %v2174_v49 = vpop.eup %2173  ;;  %2080 = vmatprep.subr.mxu1 %v2260_v7  ;;  %v855_v50 = vmul.f32 %v2172_v47, %v2156_v21  ;;  %v1525_v21 = vld [vmem:[%s2627_s2 + $0x8] sm:$0xff]  ;;  %v1528_v47 = vlaneseq }
 0x438   :  { %v853_v52 = vmul.f32 %v2174_v49, %v2158_v22 }
 0x439   :  { %2073 = vmatmul.mubr.msk.f32.vlgmr.msra.gmra.mxu1 %vm169_vm2, %v855_v50  ;;  %v869_v59 = vsel %vm169_vm2, %v855_v50, 0.0  ;;  %v2550_v48 = vshrl.u32 %v1528_v47, 7  ;;  %v2553_v50 = vld [vmem:[#allocation5] sm:$0xff] }
 0x43a   :  { %v2176_v54 = vpop.eup %2175  ;;  %v867_v55 = vsel %vm169_vm2, %v853_v52, 0.0  ;;  %2068 = vmatmul.mubr.msk.f32.vlgmr.msra.gmra.mxu0 %vm169_vm2, %v853_v52  ;;  %2081 = vmatpush3.msra.mxu1 %v1265_v34 }
 0x43b   :  { %v2178_v56 = vpop.eup %2177  ;;  %v868_v57 = vadd.f32 %v867_v55, %v866_v53  ;;  %2076 = vmatpush3.msra.mxu0 %v1189_v16  ;;  %2077 = vmatprep.mubr.msk.f32.mxu0 %vm2263_vm1, %v2260_v7  ;;  %v859_v58 = vmul.f32 %v2176_v54, %v2160_v25  ;;  %v1530_v49 = vsub.s32 0, %v2550_v48 }
 0x43c   :  { %2082 = vmatprep.mubr.msk.f32.mxu1 %vm2263_vm1, %v2260_v7  ;;  %2085 = vmatprep.subr.mxu0 %v2260_v7  ;;  %v857_v60 = vmul.f32 %v2178_v56, %v2477_v26 }
 0x43d   :  { %2090 = vmatprep.subr.mxu1 %v2260_v7  ;;  %2083 = vmatmul.mubr.msk.f32.vlgmr.msra.gmra.mxu1 %vm169_vm2, %v859_v58  ;;  %v870_v62 = vadd.f32 %v869_v59, %v868_v57  ;;  %v875_v3 = vsel %vm169_vm2, %v859_v58, 0.0  ;;  %v1531_v51 = vrot.slane %v2553_v50, %v1530_v49 }
 0x43e   :  { %v2180_v63 = vpop.eup %2179  ;;  %v874_v2 = vsel %vm169_vm2, %v857_v60, 0.0  ;;  %2078 = vmatmul.mubr.msk.f32.vlgmr.msra.gmra.mxu0 %vm169_vm2, %v857_v60  ;;  %2091 = vmatpush3.msra.mxu1 %v1417_v61 }
 0x43f   :  { %v2182_v4 = vpop.eup %2181  ;;  %2086 = vmatpush3.msra.mxu0 %v1341_v1  ;;  %2087 = vmatprep.mubr.msk.f32.mxu0 %vm2263_vm1, %v2260_v7  ;;  %v863_v6 = vmul.f32 %v2180_v63, %v2482_v29  ;;  %v872_v8 = vmul.f32 0.25, %v870_v62  ;;  %v876_v10 = vadd.f32 %v875_v3, %v874_v2 }
 0x440   :  { %2092 = vmatprep.mubr.msk.f32.mxu1 %vm2263_vm1, %v2260_v7  ;;  %v861_v9 = vmul.f32 %v2182_v4, %v2484_v30  ;;  %2095 = vmatprep.subr.mxu0 %v1527_v19 }
 0x441   :  { %2093 = vmatmul.mubr.msk.f32.vlgmr.msra.gmra.mxu1 %vm169_vm2, %v863_v6  ;;  %873 = vst.msk [vmem:[#allocation7] sm:$0xff] %vm169_vm2, %v872_v8  ;;  %v879_v13 = vsel %vm169_vm2, %v863_v6, 0.0  ;;  %v1656_v8 = vld [vmem:[%s2628_s3 + $0x10] sm:$0xff] }
 0x442   :  { %v877_v11 = vsel %vm169_vm2, %v861_v9, 0.0  ;;  %2088 = vmatmul.mubr.msk.f32.vlgmr.msra.gmra.mxu0 %vm169_vm2, %v861_v9  ;;  %v1655_v9 = vld [vmem:[%s2628_s3 + $0x8] sm:$0xff] }
 0x443   :  { %v878_v12 = vadd.f32 %v877_v11, %v876_v10  ;;  %2096 = vmatpush3.msra.mxu0 %v1527_v19  ;;  %v1654_v10 = vld [vmem:[%s2628_s3] sm:$0xff]  ;;  %v1755_v11 = vld [vmem:[%s2629_s4 + $0x38] sm:$0xff] }
 0x444   :  { %2097 = vmatprep.subr.mxu0 %v1526_v20 }
 0x445   :  { %v880_v14 = vadd.f32 %v879_v13, %v878_v12  ;;  %2098 = vmatpush3.msra.mxu0 %v1526_v20  ;;  %v1754_v12 = vld [vmem:[%s2629_s4 + $0x30] sm:$0xff]  ;;  %v1753_v13 = vld [vmem:[%s2629_s4 + $0x28] sm:$0xff] }
 0x446   :  { %2099 = vmatprep.subr.mxu0 %v1525_v21 }
 0x447   :  { %v881_v15 = vmul.f32 0.25, %v880_v14  ;;  %2100 = vmatpush3.msra.mxu0 %v1525_v21  ;;  %v1752_v14 = vld [vmem:[%s2629_s4 + $0x20] sm:$0xff] }
 0x448   :  { %2101 = vmatprep.subr.mxu0 %v1524_v23 }
 0x449   :  { %883 = vst.msk [vmem:[#allocation7 + $0x8] sm:$0xff] %vm169_vm2, %v881_v15  ;;  %2102 = vmatpush3.msra.mxu0 %v1524_v23 }
 0x44a   :  { %2117 = vmatprep.subr.mxu0 %v1755_v11 }
 0x4a1   :  { %v956_v18 = vpop.f32.mrf.mxu0 }
 0x4a3   :  { %v2059_v7 = vpop.f32.mrf.mxu0 }
 0x4f5   :  { %v1032_v22 = vpop.f32.mrf.mxu1 }
 0x4f6   :  { %1493 = vrot.lane.b32.xlu1 %v1032_v22, %s2266_s17  ;;  %v1644_v22 = vsub.s32 1, %v2550_v48 }
 0x4f7   :  { %v2064_v24 = vpop.f32.mrf.mxu1 }
 0x4f8   :  { %v1645_v24 = vrot.slane %v2553_v50, %v1644_v22 }
 0x4f9   :  { %v1184_v25 = vpop.f32.mrf.mxu1 }
 0x4fa   :  { %v1108_v26 = vpop.f32.mrf.mxu0 }
 0x4fb   :  { %1497 = vrot.lane.b32.xlu0 %v1108_v26, %s2267_s20  ;;  %v2074_v27 = vpop.f32.mrf.mxu1 }
 0x4fc   :  { %v2069_v28 = vpop.f32.mrf.mxu0 }
 0x4fd   :  { %v1336_v29 = vpop.f32.mrf.mxu1 }
 0x4fe   :  { %v1260_v30 = vpop.f32.mrf.mxu0  ;;  %1510 = vrot.lane.b32.xlu1 %v1336_v29, %s2266_s17 }
 0x4ff   :  { %1501 = vrot.lane.b32.xlu0 %v1184_v25, %s2268_s21  ;;  %v2084_v31 = vpop.f32.mrf.mxu1  ;;  %v1650_v25 = vsub.s32 2, %v2550_v48 }
 0x500   :  { %v2079_v32 = vpop.f32.mrf.mxu0 }
 0x501   :  { %v1488_v33 = vpop.f32.mrf.mxu1 }
 0x502   :  { %v1412_v34 = vpop.f32.mrf.mxu0 }
 0x503   :  { %1514 = vrot.lane.b32.xlu1 %v1412_v34, %s2267_s20  ;;  %1518 = vrot.lane.b32.xlu0 %v1488_v33, %s2268_s21  ;;  %v2094_v35 = vpop.f32.mrf.mxu1  ;;  %v1751_v34 = vld [vmem:[%s2629_s4 + $0x18] sm:$0xff] }
 0x504   :  { %v2089_v36 = vpop.f32.mrf.mxu0  ;;  %v1750_v35 = vld [vmem:[%s2629_s4 + $0x10] sm:$0xff] }
 0x505   :  { %v1749_v36 = vld [vmem:[%s2629_s4 + $0x8] sm:$0xff] }
 0x568   :  { %v1494_v37 = vpop.permute.xlu1 %1493 }
 0x569   :  { %v1504_v16 = vsel %vm169_vm2, %v956_v18, %v1494_v37  ;;  %v1748_v37 = vld [vmem:[%s2629_s4] sm:$0xff]  ;;  %s2269_s4 = smov [#allocation7]  }
 0x56a   :  { %s1895_s19 = sshll.u32 %s2269_s4, 4  ;;  %s1896_s19 = int_to_ptr.vmem [resolvable:$true] %s1895_s19 }
 0x56b   :  { %s2231_s20 = scalar_lea.vmem %s1896_s19, 256  ;;  %p2236_p11 = scmp.lt.s32.totalorder %s1896_s19, %s1896_s19 }
 0x56c   :  { %p2232_p10 = scmp.ne.s32.totalorder %s1896_s19, %s2231_s20  ;;  %p2237_p12 = scmp.lt.s32.totalorder %s2231_s20, %s2231_s20 }
 0x56d   :  { %v1498_v38 = vpop.permute.xlu0 %1497 }
 0x56e   :  { %v1506_v17 = vsel %vm1505_vm3, %v1504_v16, %v1498_v38  ;;  %v1939_v38 = vld [vmem:[#allocation2] ss:$0 sm:$0xff]  ;;  %p2238_p13 = por %p2237_p12, %p2236_p11 }
 0x570   :  { %v1511_v39 = vpop.permute.xlu1 %1510  ;;  %p2239_p0 = pnand %p2238_p13, %p2232_p10 }
 0x571   :  { %v1502_v40 = vpop.permute.xlu0 %1501  ;;  %v1521_v42 = vsel %vm169_vm2, %v1260_v30, %v1511_v39  ;;  %v1651_v30 = vrot.slane %v2553_v50, %v1650_v25 }
 0x572   :  { %v1508_v41 = vsel %vm1507_vm4, %v1506_v17, %v1502_v40 }
 0x573   :  { %2103 = vmatprep.mubr.msk.f32.mxu0 %vm73_vm0, %v1508_v41 }
 0x575   :  { %v1515_v43 = vpop.permute.xlu1 %1514  ;;  %v1519_v44 = vpop.permute.xlu0 %1518 }
 0x576   :  { %v1522_v45 = vsel %vm1505_vm3, %v1521_v42, %v1515_v43  ;;  %v1758_v43 = vsub.s32 3, %v2550_v48 }
 0x577   :  { %v1523_v46 = vsel %vm1507_vm4, %v1522_v45, %v1519_v44 }
 0x578   :  { %2104 = vmatmul.mubr.msk.f32.vlgmr.msra.gmra.mxu0 %vm73_vm0, %v1523_v46  ;;  %v1759_v44 = vrot.slane %v2553_v50, %v1758_v43 }
 0x579   :  { %2118 = vmatpush3.msra.mxu0 %v1755_v11 }
 0x57a   :  { %2119 = vmatprep.subr.mxu0 %v1754_v12 }
 0x57b   :  { %2120 = vmatpush3.msra.mxu0 %v1754_v12 }
 0x57c   :  { %2121 = vmatprep.subr.mxu0 %v1753_v13 }
 0x57d   :  { %2122 = vmatpush3.msra.mxu0 %v1753_v13 }
 0x57e   :  { %2123 = vmatprep.subr.mxu0 %v1752_v14 }
 0x57f   :  { %2124 = vmatpush3.msra.mxu0 %v1752_v14 }
 0x580   :  { %2125 = vmatprep.subr.mxu0 %v1751_v34 }
 0x581   :  { %2126 = vmatpush3.msra.mxu0 %v1751_v34 }
 0x582   :  { %2127 = vmatprep.subr.mxu0 %v1750_v35 }
 0x583   :  { %2128 = vmatpush3.msra.mxu0 %v1750_v35 }
 0x584   :  { %2129 = vmatprep.subr.mxu0 %v1749_v36 }
 0x585   :  { %2130 = vmatpush3.msra.mxu0 %v1749_v36 }
 0x586   :  { %2131 = vmatprep.subr.mxu0 %v1748_v37 }
 0x587   :  { %2132 = vmatpush3.msra.mxu0 %v1748_v37 }
 0x638   :  { %v2105_v52 = vpop.f32.mrf.mxu0 }
 0x639   :  { %v1610_v53 = vadd.f32 %v2105_v52, %v1531_v51 }
 0x63a   :  { %v1604_v54 = vpop.f32.mrf.mxu0 }
 0x63b   :  { %v1605_v55 = vadd.f32 %v1604_v54, %v1531_v51  ;;  %v1614_v56 = vadd.f32 %v1610_v53, %v2349_v5 }
 0x63d   :  { %v1618_v57 = vsel %vm73_vm0, %v1614_v56, 0.0  ;;  %v1613_v58 = vadd.f32 %v1605_v55, %v2331_v0  ;;  %v1657_v0 = vld [vmem:[%s2628_s3 + $0x18] sm:$0xff] }
 0x63e   :  { %1619 = vadd.xlane.f32.xlu0 %v1618_v57  ;;  %2106 = vmatprep.subr.mxu1 %v1657_v0 }
 0x63f   :  { %v1615_v59 = vsel %vm73_vm0, %v1613_v58, 0.0  ;;  %2107 = vmatpush3.msra.mxu1 %v1657_v0 }
 0x640   :  { %1616 = vadd.xlane.f32.xlu1 %v1615_v59  ;;  %2108 = vmatprep.subr.mxu1 %v1656_v8 }
 0x641   :  { %2109 = vmatpush3.msra.mxu1 %v1656_v8  ;;  %v1872_v8 = vsub.s32 4, %v2550_v48 }
 0x642   :  { %2110 = vmatprep.subr.mxu1 %v1655_v9 }
 0x643   :  { %2111 = vmatpush3.msra.mxu1 %v1655_v9 }
 0x644   :  { %2112 = vmatprep.subr.mxu1 %v1654_v10 }
 0x645   :  { %2113 = vmatpush3.msra.mxu1 %v1654_v10 }
 0x6c7   :  { %v1620_v60 = vpop.xlane.xlu0 %1619 }
 0x6c8   :  { %v1623_v61 = vmul.f32 0.03125, %v1620_v60 }
 0x6c9   :  { %v1617_v62 = vpop.xlane.xlu1 %1616 }
 0x6ca   :  { %v1625_v63 = vsub.f32 %v1614_v56, %v1623_v61  ;;  %v1622_v1 = vmul.f32 0.03125, %v1617_v62 }
 0x6cc   :  { %v1624_v2 = vsub.f32 %v1613_v58, %v1622_v1  ;;  %v1627_v3 = vmul.f32 %v1625_v63, %v1625_v63 }
 0x6ce   :  { %v1631_v4 = vsel %vm73_vm0, %v1627_v3, 0.0  ;;  %v1626_v6 = vmul.f32 %v1624_v2, %v1624_v2 }
 0x6cf   :  { %1632 = vadd.xlane.f32.xlu1 %v1631_v4 }
 0x6d0   :  { %v1628_v5 = vsel %vm73_vm0, %v1626_v6, 0.0 }
 0x6d1   :  { %1629 = vadd.xlane.f32.xlu0 %v1628_v5 }
 0x758   :  { %v1633_v15 = vpop.xlane.xlu1 %1632 }
 0x759   :  { %v1635_v18 = vmul.f32 0.03125, %v1633_v15 }
 0x75a   :  { %v1630_v7 = vpop.xlane.xlu0 %1629 }
 0x75b   :  { %v1637_v19 = vadd.f32 1e-05, %v1635_v18  ;;  %v1634_v20 = vmul.f32 0.03125, %v1630_v7 }
 0x75d   :  { %2183 = vrsqrt.f32 %v1637_v19  ;;  %v1636_v21 = vadd.f32 1e-05, %v1634_v20 }
 0x75f   :  { %2185 = vrsqrt.f32 %v1636_v21 }
 0x76a   :  { %v2184_v23 = vpop.eup %2183 }
 0x76b   :  { %v1641_v26 = vmul.f32 %v2184_v23, %v1625_v63 }
 0x76c   :  { %v2186_v27 = vpop.eup %2185 }
 0x76d   :  { %v1640_v28 = vmul.f32 %v2186_v27, %v1624_v2  ;;  %v1647_v29 = vmul.f32 %v1645_v24, %v1641_v26 }
 0x76f   :  { %v1646_v31 = vmul.f32 %v1645_v24, %v1640_v28  ;;  %v1653_v33 = vadd.f32 %v1651_v30, %v1647_v29 }
 0x771   :  { %v1652_v32 = vadd.f32 %v1651_v30, %v1646_v31 }
 0x773   :  { %2114 = vmatprep.mubr.msk.f32.mxu1 %vm73_vm0, %v1652_v32 }
 0x774   :  { %2115 = vmatmul.mubr.msk.f32.vlgmr.msra.gmra.mxu1 %vm73_vm0, %v1653_v33 }
 0x834   :  { %v2116_v16 = vpop.f32.mrf.mxu1 }
 0x835   :  { %v1743_v39 = vadd.f32 %v2116_v16, %v1939_v38 }
 0x836   :  { %v1737_v17 = vpop.f32.mrf.mxu1 }
 0x837   :  { %v1738_v40 = vadd.f32 %v1939_v38, %v1737_v17  ;;  %v1747_v42 = vmax.f32 %v1743_v39, 0.0 }
 0x839   :  { %v1746_v41 = vmax.f32 %v1738_v40, 0.0 }
 0x83b   :  { %2133 = vmatprep.mubr.msk.f32.mxu0 %vm1760_vm5, %v1746_v41 }
 0x83c   :  { %2134 = vmatmul.mubr.msk.f32.vlgmr.msra.gmra.mxu0 %vm1760_vm5, %v1747_v42 }
 0x8fc   :  { %v2135_v45 = vpop.f32.mrf.mxu0 }
 0x8fd   :  { %v1839_v46 = vadd.f32 %v2135_v45, %v1759_v44 }
 0x8fe   :  { %v1833_v47 = vpop.f32.mrf.mxu0 }
 0x8ff   :  { %v1834_v49 = vadd.f32 %v1833_v47, %v1759_v44  ;;  %v1843_v51 = vadd.f32 %v1839_v46, %v1653_v33 }
 0x901   :  { %v1847_v52 = vsel %vm73_vm0, %v1843_v51, 0.0  ;;  %v1842_v53 = vadd.f32 %v1834_v49, %v1652_v32 }
 0x902   :  { %1848 = vadd.xlane.f32.xlu0 %v1847_v52 }
 0x903   :  { %v1844_v54 = vsel %vm73_vm0, %v1842_v53, 0.0 }
 0x904   :  { %1845 = vadd.xlane.f32.xlu1 %v1844_v54 }
 0x98b   :  { %v1849_v55 = vpop.xlane.xlu0 %1848 }
 0x98c   :  { %v1851_v56 = vmul.f32 0.03125, %v1849_v55 }
 0x98d   :  { %v1846_v57 = vpop.xlane.xlu1 %1845 }
 0x98e   :  { %v1853_v58 = vsub.f32 %v1843_v51, %v1851_v56  ;;  %v1850_v59 = vmul.f32 0.03125, %v1846_v57 }
 0x990   :  { %v1852_v60 = vsub.f32 %v1842_v53, %v1850_v59  ;;  %v1855_v61 = vmul.f32 %v1853_v58, %v1853_v58 }
 0x992   :  { %v1859_v62 = vsel %vm73_vm0, %v1855_v61, 0.0  ;;  %v1854_v63 = vmul.f32 %v1852_v60, %v1852_v60 }
 0x993   :  { %1860 = vadd.xlane.f32.xlu0 %v1859_v62 }
 0x994   :  { %v1856_v1 = vsel %vm73_vm0, %v1854_v63, 0.0 }
 0x995   :  { %1857 = vadd.xlane.f32.xlu1 %v1856_v1 }
 0xa1c   :  { %v1861_v2 = vpop.xlane.xlu0 %1860 }
 0xa1d   :  { %v1863_v3 = vmul.f32 0.03125, %v1861_v2 }
 0xa1e   :  { %v1858_v4 = vpop.xlane.xlu1 %1857 }
 0xa1f   :  { %v1865_v6 = vadd.f32 1e-05, %v1863_v3  ;;  %v1862_v5 = vmul.f32 0.03125, %v1858_v4 }
 0xa21   :  { %2187 = vrsqrt.f32 %v1865_v6  ;;  %v1864_v0 = vadd.f32 1e-05, %v1862_v5 }
 0xa23   :  { %2189 = vrsqrt.f32 %v1864_v0 }
 0xa24   :  { %2242 = shalt.err (!%p2239_p0)
}
 0xa25   :  { %s2270_s21 = smov 128   ;;  %v1878_v9 = vsub.s32 5, %v2550_v48  ;;  %v1873_v10 = vrot.slane %v2553_v50, %v1872_v8  ;;  %s2271_s22 = smov 32  }
 0xa26   :  { %1901 = dma.vmem_to_hbm [thread:$0]  %s1896_s19, 256, %s2634_s9, [#allocation4], %s2270_s21, %s2270_s21, %s2266_s17  }
 0xa27   :  { %v1879_v13 = vrot.slane %v2553_v50, %v1878_v9 }
 0xa2e   :  { %v2188_v11 = vpop.eup %2187 }
 0xa2f   :  { %v1869_v12 = vmul.f32 %v2188_v11, %v1853_v58 }
 0xa30   :  { %v2190_v14 = vpop.eup %2189 }
 0xa31   :  { %v1875_v15 = vmul.f32 %v1873_v10, %v1869_v12  ;;  %v1868_v18 = vmul.f32 %v2190_v14, %v1852_v60 }
 0xa33   :  { %v1881_v7 = vadd.f32 %v1879_v13, %v1875_v15  ;;  %v1874_v19 = vmul.f32 %v1873_v10, %v1868_v18 }
 0xa35   :  { %1883 = vrot.lane.b32.xlu0 %v1881_v7, %s2271_s22  ;;  %v1880_v20 = vadd.f32 %v1879_v13, %v1874_v19 }
 0xaa7   :  { %v1884_v21 = vpop.permute.xlu0 %1883 }
 0xaa8   :  { %v1886_v22 = vsel %vm73_vm0, %v1880_v20, %v1884_v21 }
 0xaa9   :  { %1887 = vst.msk [vmem:[%s2633_s8] sm:$0xff] %vm1760_vm5, %v1886_v22 }
 0xaaa   :  { %2255 = dma.done.wait [#allocation4], 256  }
 0xaab   :  { %2256 = vsyncadd [#allocation4], 4294967040 }
 0xaac   :  { %1907 = vsyncpa [#allocation3], 1 }
 0xaad   :  { %1908 = vsyncpa [#allocation6], 1 }
 0xaae   :  { %1909 = vsyncpa [#allocation4], 1 }

</bundles_post_ra>
